<compile_context>
chip_gen: v7x
topology: tpu7x:2x2x1
jax: 0.10.0
libtpu: 0.0.40
codegen_flags: <defaults>
</compile_context>

<pallas_src>
import jax
import jax.numpy as jnp
from jax.experimental import pallas as pl
from jax.experimental.pallas import tpu as pltpu


def _embedding_score_kernel(h_ref, r_ref, t_ref, out_ref):
    # h_ref, t_ref: (1, TN, D); r_ref: (1, 1, D) or (1, TN, D); out_ref: (1, 1, TN)
    hv = h_ref[...].astype(jnp.float32)
    rv = r_ref[...].astype(jnp.float32)
    tv = t_ref[...].astype(jnp.float32)
    d = hv + rv - tv                      # r broadcasts over the row axis in-kernel
    s = jnp.sum(d * d, axis=-1)           # (1, TN) f32 accumulation (XLU lane reduce)
    # TODO(synk): guard sqrt with an epsilon if autodiff through this kernel is
    # ever needed (grad of sqrt at 0 is inf); forward-only is exact as-is.
    score = -jnp.sqrt(s)                  # EUP slot
    out_ref[...] = score[:, None, :].astype(out_ref.dtype)


def _choose_row_tile(n, d, itemsize, target_bytes=2 * 1024 * 1024):
    """Row tile: multiple of 128 (lane-dense output stores), ~target_bytes/input tile."""
    tn = max(128, (target_bytes // max(1, d * itemsize)) // 128 * 128)
    if tn >= n:
        return n  # full-extent block is always a legal block size
    return tn


def embedding_learner_forward(h, t, r, pos_num, row_tile=None):
    """Pallas implementation of EmbeddingLearner.forward.

    h, t : [B, N, 1, D]
    r    : [B, 1, 1, D] or [B, N, 1, D]  (broadcast over N like PyTorch)
    Returns (p_score, n_score) with shapes [B, pos_num] and [B, N - pos_num].
    """
    assert h.ndim == 4 and t.ndim == 4 and r.ndim == 4
    B, N, one, D = h.shape
    assert one == 1 and t.shape == h.shape
    assert r.shape[0] == B and r.shape[2] == 1 and r.shape[3] == D
    assert r.shape[1] in (1, N)

    h3 = jnp.squeeze(h, axis=2)   # (B, N, D)
    t3 = jnp.squeeze(t, axis=2)   # (B, N, D)
    r3 = jnp.squeeze(r, axis=2)   # (B, 1, D) or (B, N, D) -- NOT broadcast in HBM

    # TODO(synk): for very small D (e.g. 32) the 128-wide lane axis is only
    # partially used; a (N//k, k*D) repack with an in-kernel segmented reduce
    # would restore full lane density at the cost of a more fragile lowering.
    itemsize = jnp.dtype(h.dtype).itemsize
    tn = row_tile if row_tile is not None else _choose_row_tile(N, D, itemsize)
    grid = (B, pl.cdiv(N, tn))

    ht_spec = pl.BlockSpec((1, tn, D), lambda b, n: (b, n, 0))
    if r3.shape[1] == 1:
        # constant inner index -> r is re-fetched only when the batch changes
        r_spec = pl.BlockSpec((1, 1, D), lambda b, n: (b, 0, 0))
    else:
        r_spec = pl.BlockSpec((1, tn, D), lambda b, n: (b, n, 0))
    out_spec = pl.BlockSpec((1, 1, tn), lambda b, n: (b, 0, n))

    score3 = pl.pallas_call(
        _embedding_score_kernel,
        out_shape=jax.ShapeDtypeStruct((B, 1, N), h.dtype),
        grid=grid,
        in_specs=[ht_spec, r_spec, ht_spec],
        out_specs=out_spec,
        compiler_params=pltpu.CompilerParams(
            dimension_semantics=("parallel", "parallel"),
            vmem_limit_bytes=32 * 1024 * 1024,
        ),
    )(h3, r3, t3)

    score = jnp.reshape(score3, (B, N))
    p_score = score[:, :pos_num]
    n_score = score[:, pos_num:]
    return p_score, n_score


def _reference(h, t, r):
    d = (jnp.squeeze(h, 2).astype(jnp.float32)
         + jnp.squeeze(r, 2).astype(jnp.float32)
         - jnp.squeeze(t, 2).astype(jnp.float32))
    return (-jnp.sqrt(jnp.sum(d * d, axis=-1))).astype(h.dtype)


if __name__ == "__main__":
    key = jax.random.PRNGKey(0)

    # --- small demo shapes matching the module ---
    B, N, D = 2, 8, 32
    pos_num = 3
    kh, kt, kr = jax.random.split(key, 3)
    h = jax.random.normal(kh, (B, N, 1, D), dtype=jnp.float32)
    t = jax.random.normal(kt, (B, N, 1, D), dtype=jnp.float32)
    r = jax.random.normal(kr, (B, 1, 1, D), dtype=jnp.float32)   # broadcast over N

    p_score, n_score = embedding_learner_forward(h, t, r, pos_num)
    jax.block_until_ready((p_score, n_score))

    ref = _reference(h, t, r)
    assert p_score.shape == (B, pos_num)
    assert n_score.shape == (B, N - pos_num)
    assert jnp.allclose(p_score, ref[:, :pos_num], atol=1e-5, rtol=1e-5)
    assert jnp.allclose(n_score, ref[:, pos_num:], atol=1e-5, rtol=1e-5)

    # --- second check: exercise the grid (multiple row tiles + masked tail) ---
    B2, N2, D2 = 2, 300, 64
    pos2 = 4
    kh2, kt2, kr2 = jax.random.split(jax.random.PRNGKey(1), 3)
    h2 = jax.random.normal(kh2, (B2, N2, 1, D2), dtype=jnp.float32)
    t2 = jax.random.normal(kt2, (B2, N2, 1, D2), dtype=jnp.float32)
    r2 = jax.random.normal(kr2, (B2, 1, 1, D2), dtype=jnp.float32)

    p2, n2 = embedding_learner_forward(h2, t2, r2, pos2, row_tile=128)
    jax.block_until_ready((p2, n2))

    ref2 = _reference(h2, t2, r2)
    assert p2.shape == (B2, pos2) and n2.shape == (B2, N2 - pos2)
    assert jnp.allclose(p2, ref2[:, :pos2], atol=1e-4, rtol=1e-5)
    assert jnp.allclose(n2, ref2[:, pos2:], atol=1e-4, rtol=1e-5)

    print("KERNEL_OK")
</pallas_src>

<mosaic_0001>
module attributes {stable_mosaic.version = 11 : i64} {
  func.func @_embedding_score_kernel(%arg0: i32, %arg1: i32, %arg2: memref<1x8x32xf32, #tpu.memory_space<vmem>>, %arg3: memref<1x1x32xf32, #tpu.memory_space<vmem>>, %arg4: memref<1x8x32xf32, #tpu.memory_space<vmem>>, %arg5: memref<1x1x8xf32, #tpu.memory_space<vmem>>) attributes {dimension_semantics = [#tpu.dimension_semantics<parallel>, #tpu.dimension_semantics<parallel>], iteration_bounds = array<i64: 2, 1>, scalar_prefetch = 0 : i64, scratch_operands = 0 : i64, tpu.core_type = #tpu.core_type<tc>, window_params = [{transform_indices = @transform_0, window_bounds = array<i64: 1, 8, 32>}, {transform_indices = @transform_1, window_bounds = array<i64: 1, 1, 32>}, {transform_indices = @transform_2, window_bounds = array<i64: 1, 8, 32>}, {transform_indices = @transform_3, window_bounds = array<i64: 1, 1, 8>}]} {
    %c0 = arith.constant 0 : index
    %c0_0 = arith.constant 0 : index
    %c0_1 = arith.constant 0 : index
    %0 = vector.load %arg2[%c0, %c0_0, %c0_1] : memref<1x8x32xf32, #tpu.memory_space<vmem>>, vector<1x8x32xf32>
    %c0_2 = arith.constant 0 : index
    %c0_3 = arith.constant 0 : index
    %c0_4 = arith.constant 0 : index
    %1 = vector.load %arg3[%c0_2, %c0_3, %c0_4] : memref<1x1x32xf32, #tpu.memory_space<vmem>>, vector<1x1x32xf32>
    %c0_5 = arith.constant 0 : index
    %c0_6 = arith.constant 0 : index
    %c0_7 = arith.constant 0 : index
    %2 = vector.load %arg4[%c0_5, %c0_6, %c0_7] : memref<1x8x32xf32, #tpu.memory_space<vmem>>, vector<1x8x32xf32>
    %3 = vector.broadcast %1 : vector<1x1x32xf32> to vector<1x8x32xf32>
    %4 = arith.addf %0, %3 : vector<1x8x32xf32>
    %5 = arith.subf %4, %2 : vector<1x8x32xf32>
    %6 = arith.mulf %5, %5 : vector<1x8x32xf32>
    %cst = arith.constant dense<0.000000e+00> : vector<1x8xf32>
    %7 = vector.multi_reduction <add>, %6, %cst [2] : vector<1x8x32xf32> to vector<1x8xf32>
    %8 = math.sqrt %7 : vector<1x8xf32>
    %cst_8 = arith.constant 0.000000e+00 : f32
    %9 = vector.broadcast %cst_8 : f32 to vector<1x8xf32>
    %10 = arith.subf %9, %8 : vector<1x8xf32>
    %11 = vector.shape_cast %10 : vector<1x8xf32> to vector<1x1x8xf32>
    %c0_9 = arith.constant 0 : index
    %c0_10 = arith.constant 0 : index
    %c0_11 = arith.constant 0 : index
    %12 = vector.load %arg5[%c0_9, %c0_10, %c0_11] : memref<1x1x8xf32, #tpu.memory_space<vmem>>, vector<1x1x8xf32>
    tpu.vector_store %arg5[%c0_9, %c0_10, %c0_11], %11 {strides = array<i32>} : memref<1x1x8xf32, #tpu.memory_space<vmem>>, vector<1x1x8xf32>,
    return
  }
  func.func @transform_0(%arg0: i32, %arg1: i32) -> (i32, i32, i32) {
    %c0_i32 = arith.constant 0 : i32
    %c0_i32_0 = arith.constant 0 : i32
    return %arg0, %arg1, %c0_i32 : i32, i32, i32
  }
  func.func @transform_1(%arg0: i32, %arg1: i32) -> (i32, i32, i32) {
    %c0_i32 = arith.constant 0 : i32
    %c0_i32_0 = arith.constant 0 : i32
    %c0_i32_1 = arith.constant 0 : i32
    return %arg0, %c0_i32, %c0_i32_0 : i32, i32, i32
  }
  func.func @transform_2(%arg0: i32, %arg1: i32) -> (i32, i32, i32) {
    %c0_i32 = arith.constant 0 : i32
    %c0_i32_0 = arith.constant 0 : i32
    return %arg0, %arg1, %c0_i32 : i32, i32, i32
  }
  func.func @transform_3(%arg0: i32, %arg1: i32) -> (i32, i32, i32) {
    %c0_i32 = arith.constant 0 : i32
    %c0_i32_0 = arith.constant 0 : i32
    return %arg0, %c0_i32, %arg1 : i32, i32, i32
  }
}

</mosaic_0001>

<bundles_post_ra>
// kernel: tpu_custom_call.1
= control target key start
LH: loop header
LB: loop body
LE: loop exit
PB: predicated region body
PF: predicated region fallthrough
CT: control target
= control target key end

     0   :  { %8 = vsyncpa [#allocation3], 0  ;;  %s894_s0 = inlined_call_operand.hbm [shape: f32[2,8,32], index: 0, kind: input, shape index: {}]   ;;  %s895_s1 = inlined_call_operand.vmem [shape: f32[2,1,32], index: 1, kind: input, shape index: {}]   ;;  %s896_s2 = inlined_call_operand.hbm [shape: f32[2,8,32], index: 2, kind: input, shape index: {}]   ;;  %s897_s3 = inlined_call_operand.hbm [shape: f32[2,1,8], index: 3, kind: output, shape index: {}]  }
   0x1   :  { %10 = vsyncpa [#allocation3 + $0x1], 0 }
   0x2   :  { %11 = vsyncpa [#allocation6], 0 }
   0x3   :  { %13 = vsyncpa [#allocation6 + $0x1], 0 }
   0x4   :  { %14 = vsyncpa [#allocation4], 0 }
   0x5   :  { %16 = vsyncpa [#allocation4 + $0x1], 0  ;;  %s668_s12 = smov 0   ;;  %s670_s13 = smov 0  }
   0x6   :  { %s672_s14 = smov 0   ;;  %s674_s15 = smov 0  }
   0x7   :  { %s676_s16 = smov 0   ;;  %s678_s17 = smov 0  }
   0x8 LB: > { %s413_s18 = sadd.s32 4294967295, %s643_s17   ;;  %s414_s19 = sadd.s32 4294967294, %s643_s17   ;;  %s643_s17 = sphi %s678_s17, %s22_s17   ;;  %s639_s16 = sphi %s676_s16, %s917_s16   ;;  %s635_s15 = sphi %s674_s15, %s916_s15   ;;  %s631_s14 = sphi %s672_s14, %s915_s14   ;;  %s627_s13 = sphi %s670_s13, %s914_s13   ;;  %s623_s12 = sphi %s668_s12, %s913_s12  }
   0x9   : > { %s34_s20 = sadd.s32 1, %s639_s16  ;;  %s43_s21 = sadd.s32 1, %s631_s14 }
   0xa   : > { %p36_p0 = scmp.ge.s32.totalorder %s34_s20, 2  ;;  %p50_p1 = scmp.ne.s32.totalorder %s631_s14, %s627_s13 }
   0xb   : > { %p51_p2 = scmp.eq.s32.totalorder %s643_s17, 0  ;;  %p56_p3 = scmp.ne.s32.totalorder %s627_s13, %s623_s12 }
   0xc   : > { %s919_s20 = smov (%p36_p0, %s34_s20), 0  ;;  %p57_p5 = scmp.eq.s32.totalorder %s413_s18, 0 }
   0xd   : > { %p709_p4 = por %p51_p2, %p50_p1  ;;  %s38_s23 = ssub.s32 %s639_s16, %s919_s20 }
   0xe   : > { %p136_p6 = scmp.eq.s32.totalorder %s413_s18, 1  ;;  %p41_p7 = scmp.eq.s32.totalorder %s38_s23, 0 }
   0xf   : > { %p715_p8 = por %p57_p5, %p56_p3  ;;  %p142_p10 = scmp.eq.s32.totalorder %s414_s19, 1 }
  0x10   : > { %p719_p9 = por %p136_p6, %p50_p1  ;;  %p445_p13 = scmp.lt.s32.totalorder %s643_s17, 2 }
  0x11   : > { %s901_s24 = scalar_select %p715_p8, 1, 0 }
  0x12   : > { %s902_s25 = scalar_select %p719_p9, 1, 0 }
  0x13   : > { %s724_s26 = scalar_select %p41_p7, %s631_s14, %s43_s21  }
  0x14   : > { %p726_p11 = por %p142_p10, %p56_p3  ;;  %s733_s28 = sand.u32 1, %s631_s14  }
  0x15   : > { %s417_s29 = sshll.u32 %s733_s28, 3  ;;  %s418_s30 = sshll.u32 %s639_s16, 7 }
  0x16   : > { %s903_s27 = scalar_select %p726_p11, 1, 0 }
  0x17   : > { %s742_s6 = scalar_lea.hbm %s894_s0, %s418_s30  ;;  %s166_s7 = scalar_lea.vmem [#allocation2], %s417_s29 }
  0x18   : > { %s174_s8 = sshll.u32 %s166_s7, 4  ;;  %p750_p0 = pnand %p445_p13, %p709_p4  ;;  %s746_s8 = int_to_ptr.vmem [resolvable:$true] %s174_s8 }
  0x19   : > { %s163_s10 = scalar_lea.sflag [#allocation3], %s733_s28  ;;  %s497_s11 = scalar_lea.hbm %s742_s6, 128 }
  0x1a   : > { %p498_p3 = scmp.ne.s32.totalorder %s742_s6, %s497_s11  ;;  %p499_p5 = pneg %p750_p0 }
  0x1b   : > { %s502_s21 = scalar_lea.hbm %s894_s0, 256  ;;  %p503_p4 = scmp.lt.u32.totalorder %s742_s6, %s894_s0 }
  0x1c   : > { %p500_p6 = pnand %p499_p5, %p498_p3  ;;  %p504_p10 = scmp.lt.u32.totalorder %s502_s21, %s497_s11 }
  0x1d   : > { %p506_p12 = scmp.lt.u32.totalorder %s497_s11, %s742_s6 }
  0x1e   : > { %p501_p7 = pneg %p500_p6  ;;  %p505_p13 = por %p504_p10, %p503_p4 }
  0x20   : > { %p507_p1 = por %p506_p12, %p505_p13 }
  0x22   : > { %p508_p2 = pnand %p507_p1, %p501_p7 }
  0x24   : > { %511 = shalt.err (!%p508_p2)
}
  0x25   : > { %s512_s4 = scalar_lea.vmem %s746_s8, 128  ;;  %s645_s5 = smov [#allocation2]  }
  0x26   : > { %p513_p3 = scmp.ne.s32.totalorder %s746_s8, %s512_s4  ;;  %s517_s7 = sshll.u32 %s645_s5, 4  ;;  %s518_s7 = int_to_ptr.vmem [resolvable:$false] %s517_s7 }
  0x27   : > { %s519_s18 = scalar_lea.vmem %s518_s7, 256  ;;  %p520_p9 = scmp.lt.s32.totalorder %s746_s8, %s518_s7 }
  0x28   : > { %p515_p6 = pnand %p513_p3, %p499_p5  ;;  %p521_p4 = scmp.lt.s32.totalorder %s519_s18, %s512_s4 }
  0x2a   : > { %p516_p11 = pneg %p515_p6  ;;  %p522_p10 = por %p521_p4, %p520_p9 }
  0x2c   : > { %p523_p12 = pnand %p522_p10, %p516_p11 }
  0x2e   : > { %526 = shalt.err (!%p523_p12)
}
  0x2f   : > { %437 = dma.hbm_to_vmem [thread:$0]  (!%p750_p0), %s742_s6, 128, %s746_s8, %s163_s10  }
  0x30   : > { %p905_p1 = scmp.lt.s32.totalorder %s643_s17, 3  ;;  %p906_p2 = scmp.ge.s32.totalorder %s643_s17, 1 }
  0x31   : > { %s795_s22 = scalar_lea.hbm %s896_s2, %s418_s30  ;;  %s191_s23 = scalar_lea.vmem [#allocation5], %s417_s29 }
  0x32   : > { %p786_p7 = pnand %p906_p2, %p905_p1  ;;  %s199_s4 = sshll.u32 %s191_s23, 4  ;;  %s200_s4 = int_to_ptr.vmem [resolvable:$true] %s199_s4 }
  0x33   : > { %s188_s6 = scalar_lea.sflag [#allocation6], %s733_s28  ;;  %s527_s8 = scalar_lea.hbm %s795_s22, 128 }
  0x34   : > { %s907_s11 = scalar_select %p786_p7, 1, 0 }
  0x35   : > { %p528_p9 = scmp.ne.s32.totalorder %s795_s22, %s527_s8  ;;  %s532_s30 = scalar_lea.hbm %s896_s2, 256 }
  0x36   : > { %p533_p3 = scmp.lt.u32.totalorder %s795_s22, %s896_s2  ;;  %p534_p6 = scmp.lt.u32.totalorder %s532_s30, %s527_s8 }
  0x37   : > { %p530_p11 = pnand %p528_p9, %p499_p5  ;;  %p536_p10 = scmp.lt.u32.totalorder %s527_s8, %s795_s22 }
  0x38   : > { %p535_p4 = por %p534_p6, %p533_p3 }
  0x39   : > { %p531_p13 = pneg %p530_p11 }
  0x3a   : > { %p537_p12 = por %p536_p10, %p535_p4 }
  0x3c   : > { %p538_p1 = pnand %p537_p12, %p531_p13 }
  0x3e   : > { %541 = shalt.err (!%p538_p1)
}
  0x3f   : > { %s542_s28 = scalar_lea.vmem %s200_s4, 128  ;;  %s646_s29 = smov [#allocation5]  }
  0x40   : > { %p543_p2 = scmp.ne.s32.totalorder %s200_s4, %s542_s28  ;;  %s547_s19 = sshll.u32 %s646_s29, 4  ;;  %s548_s19 = int_to_ptr.vmem [resolvable:$false] %s547_s19 }
  0x41   : > { %s549_s21 = scalar_lea.vmem %s548_s19, 256  ;;  %p550_p8 = scmp.lt.s32.totalorder %s200_s4, %s548_s19 }
  0x42   : > { %p545_p9 = pnand %p543_p2, %p499_p5  ;;  %p551_p7 = scmp.lt.s32.totalorder %s549_s21, %s542_s28 }
  0x44   : > { %p546_p11 = pneg %p545_p9  ;;  %p552_p3 = por %p551_p7, %p550_p8 }
  0x46   : > { %p553_p6 = pnand %p552_p3, %p546_p11 }
  0x48   : > { %556 = shalt.err (!%p553_p6)
}
  0x49   : > { %440 = dma.hbm_to_vmem [thread:$0]  (!%p750_p0), %s795_s22, 128, %s200_s4, %s188_s6  }
  0x4a   : > { %p908_p13 = scmp.ne.s32.totalorder %s907_s11, 0 }
  0x4b   : > { %s822_s23 = sand.u32 (!%p908_p13), 1, %s627_s13   ;;  %p909_p5 = scmp.ne.s32.totalorder (!%p908_p13), %s901_s24, 0 }
  0x4c   : > { %208 = sbr.rel (%p908_p13) target bundleno = 274 (0x112), region = 32  ;;  %s422_s8 = sshll.u32 (!%p908_p13), %s822_s23, 3 }
  0x4d   : > { %s211_s10 = scalar_lea.sflag (!%p908_p13), [#allocation3], %s822_s23  ;;  %s214_s5 = scalar_lea.vmem (!%p908_p13), [#allocation2], %s422_s8 }
  0x53   : > { %610 = dma.done.wait (%p909_p5), %s211_s10, 128  }
  0x54   : > { %612 = vsyncadd (%p909_p5), %s211_s10, 4294967168  ;;  %s220_s9 = scalar_lea.sflag [#allocation6], %s822_s23  ;;  %s223_s22 = scalar_lea.vmem [#allocation5], %s422_s8 }
  0x55   : > { %614 = dma.done.wait (%p909_p5), %s220_s9, 128  }
  0x56   : > { %616 = vsyncadd (%p909_p5), %s220_s9, 4294967168  ;;  %p253_p8 = scmp.lt.s32.totalorder %s635_s15, 1  ;;  %v256_v0 = vld [vmem:[%s214_s5] sm:$0xff]  ;;  %v258_v2 = vld [vmem:[%s223_s22] sm:$0xff]  ;;  %vm268_vm0 = vcmask 261120   ;;  %v281_v8 = vlaneseq  ;;  %s425_s24 = sshll.u32 %s635_s15, 4 }
  0x57   : > { %s252_s7 = scalar_lea.vmem [#allocation7], %s822_s23  ;;  %vm288_vm3 = vcmask 57344   ;;  %s845_s19 = scalar_lea.hbm %s897_s3, %s425_s24 }
  0x58   : > { %s254_s11 = scalar_select %p253_p8, %s635_s15, 1  ;;  %v282_v9 = vand.u32 127, %v281_v8  ;;  %v284_v10 = vshrl.u32 %v281_v8, 7 }
  0x59   : > { %s304_s18 = sshll.u32 %s252_s7, 4  ;;  %s291_s21 = scalar_lea.sflag [#allocation4], %s822_s23  ;;  %s847_s18 = int_to_ptr.vmem [resolvable:$true] %s304_s18 }
  0x5a   : > { %s255_s30 = scalar_lea.vmem %s895_s1, %s254_s11  ;;  %v285_v15 = vsub.s32 %v282_v9, %v284_v10  ;;  %s557_s8 = scalar_lea.vmem %s847_s18, 16 }
  0x5b   : > { %v424_v1 = vld [vmem:[%s255_s30] ss:$0 sm:$0xff]  ;;  %p558_p0 = scmp.ne.s32.totalorder %s847_s18, %s557_s8  ;;  %p910_p7 = scmp.ne.s32.totalorder %s902_s25, 0 }
  0x5c   : > { %v265_v3 = vadd.f32 %v424_v1, %v256_v0  ;;  %s647_s15 = smov [#allocation7]  }
  0x5d   : > { %p559_p4 = pnand %p558_p0, %p910_p7  ;;  %s561_s10 = sshll.u32 %s647_s15, 4  ;;  %s562_s10 = int_to_ptr.vmem [resolvable:$false] %s561_s10 }
  0x5e   : > { %v266_v4 = vsub.f32 %v265_v3, %v258_v2  ;;  %s563_s5 = scalar_lea.vmem %s562_s10, 32  ;;  %p564_p12 = scmp.lt.s32.totalorder %s847_s18, %s562_s10 }
  0x5f   : > { %p560_p10 = pneg %p559_p4  ;;  %p565_p1 = scmp.lt.s32.totalorder %s563_s5, %s557_s8 }
  0x60   : > { %v267_v5 = vmul.f32 %v266_v4, %v266_v4 }
  0x61   : > { %p566_p2 = por %p565_p1, %p564_p12 }
  0x62   : > { %v269_v6 = vsel %vm268_vm0, %v267_v5, 0.0 }
  0x63   : > { %270 = vadd.xlane.f32.xlu0 %v269_v6  ;;  %p567_p9 = pnand %p566_p2, %p560_p10 }
  0xf0   : > { %v271_v7 = vpop.xlane.xlu0 %270 }
  0xf1   : > { %495 = vrsqrt.f32 %v271_v7  ;;  %vm274_vm1 = vcmp.eq.f32.partialorder %v271_v7, inf  ;;  %v277_v13 = vand.u32 2147483648, %v271_v7  ;;  %vm276_vm2 = vcmp.eq.f32.partialorder %v271_v7, 0.0 }
  0xfb   : > { %v496_v11 = vpop.eup %495 }
  0xfc   : > { %v273_v12 = vmul.f32 %v496_v11, %v271_v7 }
  0xfe   : > { %v275_v14 = vsel %vm274_vm1, %v271_v7, %v273_v12 }
  0xff   : > { %v278_v16 = vsel %vm276_vm2, %v277_v13, %v275_v14 }
 0x100   : > { %v279_v17 = vsub.f32 0.0, %v278_v16 }
 0x102   : > { %v286_v18 = vrot.slane %v279_v17, %v285_v15 }
 0x104   : > { %289 = vst.msk [vmem:[%s252_s7] sm:$0x1] %vm288_vm3, %v286_v18 }
 0x105   : > { %570 = shalt.err (!%p567_p9)
}
 0x106   : > { %s571_s23 = scalar_lea.hbm %s845_s19, 16  ;;  %s575_s11 = scalar_lea.hbm %s897_s3, 32 }
 0x107   : > { %p572_p11 = scmp.ne.s32.totalorder %s845_s19, %s571_s23  ;;  %p576_p13 = scmp.lt.u32.totalorder %s845_s19, %s897_s3 }
 0x108   : > { %p577_p5 = scmp.lt.u32.totalorder %s575_s11, %s571_s23  ;;  %p579_p0 = scmp.lt.u32.totalorder %s571_s23, %s845_s19 }
 0x109   : > { %p573_p3 = pnand %p572_p11, %p910_p7 }
 0x10a   : > { %p578_p8 = por %p577_p5, %p576_p13 }
 0x10b   : > { %p574_p6 = pneg %p573_p3 }
 0x10c   : > { %p580_p4 = por %p579_p0, %p578_p8 }
 0x10e   : > { %p581_p10 = pnand %p580_p4, %p574_p6 }
 0x110   : > { %584 = shalt.err (!%p581_p10)
}
 0x111   : > { %432 = dma.vmem_to_hbm [thread:$0]  (%p910_p7), %s847_s18, 16, %s845_s19, %s291_s21  }
 0x112 PF: > { %s316_s30 = sand.u32 1, %s623_s12   ;;  %p911_p12 = scmp.ne.s32.totalorder %s903_s27, 0 }
 0x113   : > { %p912_p1 = scmp.ge.s32.totalorder %s643_s17, 2  ;;  %s317_s24 = scalar_lea.sflag [#allocation4], %s316_s30 }
 0x115   : > { %p442_p2 = pnand %p912_p1, %p911_p12 }
 0x117   : > { %618 = dma.done.wait (!%p442_p2), %s317_s24, 16  }
 0x118   : > { %620 = vsyncadd (!%p442_p2), %s317_s24, 4294967280  ;;  %s22_s17 = sadd.s32 1, %s643_s17   ;;  %s913_s12 = smov %s627_s13 }
 0x119   : > { %p19_p9 = scmp.ge.s32.totalorder %s22_s17, 4   ;;  %s914_s13 = smov %s631_s14 }
 0x11a   : > { %s915_s14 = smov %s724_s26  ;;  %s916_s15 = smov %s639_s16 }
 0x11b   : > { %s917_s16 = smov %s919_s20  ;;  %21 = sbr.rel (!%p19_p9) target bundleno = 8 (0x8), region = 93 }
 0x122   :  { %321 = vsyncpa [#allocation3], 1 }
 0x123   :  { %323 = vsyncpa [#allocation3 + $0x1], 1 }
 0x124   :  { %324 = vsyncpa [#allocation6], 1 }
 0x125   :  { %326 = vsyncpa [#allocation6 + $0x1], 1 }
 0x126   :  { %327 = vsyncpa [#allocation4], 1 }
 0x127   :  { %329 = vsyncpa [#allocation4 + $0x1], 1 }

</bundles_post_ra>
